<compile_context>
chip_gen: v7x
topology: tpu7x:2x2x1
jax: 0.10.0
libtpu: 0.0.40
codegen_flags: <defaults>
</compile_context>

<pallas_src>
import jax
import jax.numpy as jnp
from jax.experimental import pallas as pl
from jax.experimental.pallas import tpu as pltpu

_HID1, _HID2, _HID3 = 32, 128, 32
_OUT_PAD = 128  # lane-dense padded output width (real logits live in [:, :2])


def _dqn_kernel(x_ref,
                w1_ref, b1_ref,
                w2_ref, b2_ref,
                w3_ref, b3_ref,
                w4_ref, b4_ref,
                out_ref):
    """Fused 4-layer MLP on one (TB, n_in) batch tile."""
    # ---- Layer 1: K = n_inputs (tiny) -> keep it off the MXU. ----
    # Unrolled broadcast multiply-adds on the VPU avoid an MXU fill/drain
    # bubble sitting on the serial dependency chain.
    x = x_ref[...]                       # (TB, n_in) f32
    w1 = w1_ref[...]                     # (n_in, 32)
    h1 = b1_ref[...]                     # (1, 32) -> broadcasts to (TB, 32)
    for k in range(x.shape[1]):          # static unroll (n_in = 4)
        h1 = h1 + x[:, k:k + 1] * w1[k:k + 1, :]
    h1 = jnp.maximum(h1, 0.0)

    # ---- Layers 2 & 3: proper MXU matmuls with f32 accumulation. ----
    h2 = jnp.dot(h1, w2_ref[...], preferred_element_type=jnp.float32) + b2_ref[...]
    h2 = jnp.maximum(h2, 0.0)

    h3 = jnp.dot(h2, w3_ref[...], preferred_element_type=jnp.float32) + b3_ref[...]
    h3 = jnp.maximum(h3, 0.0)

    # ---- Output layer: w4 zero-padded to 128 lanes -> lane-dense store. ----
    out = jnp.dot(h3, w4_ref[...], preferred_element_type=jnp.float32) + b4_ref[...]
    out_ref[...] = out.astype(out_ref.dtype)


def dqn_forward(x, params, *, block_b=128):
    """x: (B, n_inputs) f32. params: dict of (in,out) weights and (1,out) biases."""
    B, n_in = x.shape
    n_out = params["w4"].shape[1]

    # Pad the real (32, n_out) output layer to a lane-dense 128-wide tile.
    w4p = jnp.zeros((_HID3, _OUT_PAD), jnp.float32).at[:, :n_out].set(params["w4"])
    b4p = jnp.zeros((1, _OUT_PAD), jnp.float32).at[:, :n_out].set(params["b4"])

    # Batch tiling: TB is a multiple of 8 sublanes; ragged batch -> zero-pad.
    tb = min(block_b, max(8, ((B + 7) // 8) * 8))
    b_pad = ((B + tb - 1) // tb) * tb
    if b_pad != B:
        x = jnp.pad(x, ((0, b_pad - B), (0, 0)))
    nb = b_pad // tb

    # Weights/biases: full-array blocks with a constant index_map so they are
    # fetched once and stay resident in VMEM for every grid step.
    def resident(arr):
        return pl.BlockSpec(arr.shape, lambda i: (0, 0))

    out = pl.pallas_call(
        _dqn_kernel,
        out_shape=jax.ShapeDtypeStruct((b_pad, _OUT_PAD), jnp.float32),
        grid=(nb,),
        in_specs=[
            pl.BlockSpec((tb, n_in), lambda i: (i, 0)),   # x: tiled over batch
            resident(params["w1"]), resident(params["b1"]),
            resident(params["w2"]), resident(params["b2"]),
            resident(params["w3"]), resident(params["b3"]),
            resident(w4p), resident(b4p),
        ],
        out_specs=pl.BlockSpec((tb, _OUT_PAD), lambda i: (i, 0)),
        compiler_params=pltpu.CompilerParams(
            dimension_semantics=("parallel",)),            # megacore on v7x
    )(x,
      params["w1"], params["b1"],
      params["w2"], params["b2"],
      params["w3"], params["b3"],
      w4p, b4p)

    # Drop batch padding and the padded logit lanes.
    return out[:B, :n_out]


def init_dqn_params(key, n_inputs, n_outputs=2):
    """Deterministic init mimicking PyTorch Linear default (U[-1/sqrt(fan_in), +])."""
    dims = [(n_inputs, _HID1), (_HID1, _HID2), (_HID2, _HID3), (_HID3, n_outputs)]
    params = {}
    keys = jax.random.split(key, 2 * len(dims))
    for i, (fan_in, fan_out) in enumerate(dims):
        bound = 1.0 / jnp.sqrt(float(fan_in))
        w = jax.random.uniform(keys[2 * i], (fan_in, fan_out),
                               minval=-bound, maxval=bound, dtype=jnp.float32)
        b = jax.random.uniform(keys[2 * i + 1], (1, fan_out),
                               minval=-bound, maxval=bound, dtype=jnp.float32)
        params[f"w{i + 1}"] = w
        params[f"b{i + 1}"] = b
    return params


def dqn_reference(x, params):
    """Pure-JAX reference for correctness check."""
    h = jnp.maximum(x @ params["w1"] + params["b1"], 0.0)
    h = jnp.maximum(h @ params["w2"] + params["b2"], 0.0)
    h = jnp.maximum(h @ params["w3"] + params["b3"], 0.0)
    return h @ params["w4"] + params["b4"]


if __name__ == "__main__":
    key = jax.random.PRNGKey(0)
    k_params, k_x1, k_x2 = jax.random.split(key, 3)

    n_inputs = 4   # CartPole observation dim
    n_outputs = 2  # CartPole action dim (lout hardcodes 2 in the module)
    params = init_dqn_params(k_params, n_inputs, n_outputs)

    # Batched forward: 256 states -> 2 grid steps of TB=128.
    x = jax.random.normal(k_x1, (256, n_inputs), dtype=jnp.float32)
    out = jax.block_until_ready(dqn_forward(x, params))
    ref = dqn_reference(x, params)
    assert out.shape == (256, n_outputs)
    assert jnp.allclose(out, ref, atol=1e-4, rtol=1e-4), "mismatch vs reference (B=256)"

    # Ragged small batch exercises the zero-pad + tail-slice path.
    x_small = jax.random.normal(k_x2, (20, n_inputs), dtype=jnp.float32)
    out_small = jax.block_until_ready(dqn_forward(x_small, params))
    ref_small = dqn_reference(x_small, params)
    assert out_small.shape == (20, n_outputs)
    assert jnp.allclose(out_small, ref_small, atol=1e-4, rtol=1e-4), \
        "mismatch vs reference (B=20)"

    print("KERNEL_OK")
</pallas_src>

<mosaic_0001>
module attributes {stable_mosaic.version = 11 : i64} {
  func.func @_dqn_kernel(%arg0: i32, %arg1: memref<128x4xf32, #tpu.memory_space<vmem>>, %arg2: memref<4x32xf32, #tpu.memory_space<vmem>>, %arg3: memref<1x32xf32, #tpu.memory_space<vmem>>, %arg4: memref<32x128xf32, #tpu.memory_space<vmem>>, %arg5: memref<1x128xf32, #tpu.memory_space<vmem>>, %arg6: memref<128x32xf32, #tpu.memory_space<vmem>>, %arg7: memref<1x32xf32, #tpu.memory_space<vmem>>, %arg8: memref<32x128xf32, #tpu.memory_space<vmem>>, %arg9: memref<1x128xf32, #tpu.memory_space<vmem>>, %arg10: memref<128x128xf32, #tpu.memory_space<vmem>>) attributes {dimension_semantics = [#tpu.dimension_semantics<parallel>], iteration_bounds = array<i64: 2>, scalar_prefetch = 0 : i64, scratch_operands = 0 : i64, tpu.core_type = #tpu.core_type<tc>, window_params = [{transform_indices = @transform_0, window_bounds = array<i64: 128, 4>}, {pipeline_mode = #tpu.pipeline_mode<synchronous>, transform_indices = @transform_1, window_bounds = array<i64: 4, 32>}, {pipeline_mode = #tpu.pipeline_mode<synchronous>, transform_indices = @transform_2, window_bounds = array<i64: 1, 32>}, {pipeline_mode = #tpu.pipeline_mode<synchronous>, transform_indices = @transform_3, window_bounds = array<i64: 32, 128>}, {pipeline_mode = #tpu.pipeline_mode<synchronous>, transform_indices = @transform_4, window_bounds = array<i64: 1, 128>}, {pipeline_mode = #tpu.pipeline_mode<synchronous>, transform_indices = @transform_5, window_bounds = array<i64: 128, 32>}, {pipeline_mode = #tpu.pipeline_mode<synchronous>, transform_indices = @transform_6, window_bounds = array<i64: 1, 32>}, {pipeline_mode = #tpu.pipeline_mode<synchronous>, transform_indices = @transform_7, window_bounds = array<i64: 32, 128>}, {pipeline_mode = #tpu.pipeline_mode<synchronous>, transform_indices = @transform_8, window_bounds = array<i64: 1, 128>}, {transform_indices = @transform_9, window_bounds = array<i64: 128, 128>}]} {
    %c0 = arith.constant 0 : index
    %c0_0 = arith.constant 0 : index
    %0 = vector.load %arg1[%c0, %c0_0] : memref<128x4xf32, #tpu.memory_space<vmem>>, vector<128x4xf32>
    %c0_1 = arith.constant 0 : index
    %c0_2 = arith.constant 0 : index
    %1 = vector.load %arg2[%c0_1, %c0_2] : memref<4x32xf32, #tpu.memory_space<vmem>>, vector<4x32xf32>
    %c0_3 = arith.constant 0 : index
    %c0_4 = arith.constant 0 : index
    %2 = vector.load %arg3[%c0_3, %c0_4] : memref<1x32xf32, #tpu.memory_space<vmem>>, vector<1x32xf32>
    %3 = vector.extract_strided_slice %0 {offsets = [0, 0], sizes = [128, 1], strides = [1, 1]} : vector<128x4xf32> to vector<128x1xf32>
    %4 = vector.extract_strided_slice %1 {offsets = [0, 0], sizes = [1, 32], strides = [1, 1]} : vector<4x32xf32> to vector<1x32xf32>
    %5 = vector.broadcast %3 : vector<128x1xf32> to vector<128x32xf32>
    %6 = vector.broadcast %4 : vector<1x32xf32> to vector<128x32xf32>
    %7 = arith.mulf %5, %6 : vector<128x32xf32>
    %8 = vector.broadcast %2 : vector<1x32xf32> to vector<128x32xf32>
    %9 = arith.addf %8, %7 : vector<128x32xf32>
    %10 = vector.extract_strided_slice %0 {offsets = [0, 1], sizes = [128, 1], strides = [1, 1]} : vector<128x4xf32> to vector<128x1xf32>
    %11 = vector.extract_strided_slice %1 {offsets = [1, 0], sizes = [1, 32], strides = [1, 1]} : vector<4x32xf32> to vector<1x32xf32>
    %12 = vector.broadcast %10 : vector<128x1xf32> to vector<128x32xf32>
    %13 = vector.broadcast %11 : vector<1x32xf32> to vector<128x32xf32>
    %14 = arith.mulf %12, %13 : vector<128x32xf32>
    %15 = arith.addf %9, %14 : vector<128x32xf32>
    %16 = vector.extract_strided_slice %0 {offsets = [0, 2], sizes = [128, 1], strides = [1, 1]} : vector<128x4xf32> to vector<128x1xf32>
    %17 = vector.extract_strided_slice %1 {offsets = [2, 0], sizes = [1, 32], strides = [1, 1]} : vector<4x32xf32> to vector<1x32xf32>
    %18 = vector.broadcast %16 : vector<128x1xf32> to vector<128x32xf32>
    %19 = vector.broadcast %17 : vector<1x32xf32> to vector<128x32xf32>
    %20 = arith.mulf %18, %19 : vector<128x32xf32>
    %21 = arith.addf %15, %20 : vector<128x32xf32>
    %22 = vector.extract_strided_slice %0 {offsets = [0, 3], sizes = [128, 1], strides = [1, 1]} : vector<128x4xf32> to vector<128x1xf32>
    %23 = vector.extract_strided_slice %1 {offsets = [3, 0], sizes = [1, 32], strides = [1, 1]} : vector<4x32xf32> to vector<1x32xf32>
    %24 = vector.broadcast %22 : vector<128x1xf32> to vector<128x32xf32>
    %25 = vector.broadcast %23 : vector<1x32xf32> to vector<128x32xf32>
    %26 = arith.mulf %24, %25 : vector<128x32xf32>
    %27 = arith.addf %21, %26 : vector<128x32xf32>
    %cst = arith.constant 0.000000e+00 : f32
    %28 = vector.broadcast %cst : f32 to vector<128x32xf32>
    %29 = arith.maximumf %27, %28 : vector<128x32xf32>
    %c0_5 = arith.constant 0 : index
    %c0_6 = arith.constant 0 : index
    %30 = vector.load %arg4[%c0_5, %c0_6] : memref<32x128xf32, #tpu.memory_space<vmem>>, vector<32x128xf32>
    %cst_7 = arith.constant dense<0.000000e+00> : vector<128x128xf32>
    %31 = tpu.matmul %29, %30, %cst_7 {dimension_numbers = #tpu.dot_dimension_numbers<[1], [0], [0], [1], [0, 0, 1, 1], [], []>} : vector<128x32xf32>, vector<32x128xf32>, vector<128x128xf32> -> vector<128x128xf32>
    %c0_8 = arith.constant 0 : index
    %c0_9 = arith.constant 0 : index
    %32 = vector.load %arg5[%c0_8, %c0_9] : memref<1x128xf32, #tpu.memory_space<vmem>>, vector<1x128xf32>
    %33 = vector.broadcast %32 : vector<1x128xf32> to vector<128x128xf32>
    %34 = arith.addf %31, %33 : vector<128x128xf32>
    %cst_10 = arith.constant 0.000000e+00 : f32
    %35 = vector.broadcast %cst_10 : f32 to vector<128x128xf32>
    %36 = arith.maximumf %34, %35 : vector<128x128xf32>
    %c0_11 = arith.constant 0 : index
    %c0_12 = arith.constant 0 : index
    %37 = vector.load %arg6[%c0_11, %c0_12] : memref<128x32xf32, #tpu.memory_space<vmem>>, vector<128x32xf32>
    %cst_13 = arith.constant dense<0.000000e+00> : vector<128x32xf32>
    %38 = tpu.matmul %36, %37, %cst_13 {dimension_numbers = #tpu.dot_dimension_numbers<[1], [0], [0], [1], [0, 0, 1, 1], [], []>} : vector<128x128xf32>, vector<128x32xf32>, vector<128x32xf32> -> vector<128x32xf32>
    %c0_14 = arith.constant 0 : index
    %c0_15 = arith.constant 0 : index
    %39 = vector.load %arg7[%c0_14, %c0_15] : memref<1x32xf32, #tpu.memory_space<vmem>>, vector<1x32xf32>
    %40 = vector.broadcast %39 : vector<1x32xf32> to vector<128x32xf32>
    %41 = arith.addf %38, %40 : vector<128x32xf32>
    %cst_16 = arith.constant 0.000000e+00 : f32
    %42 = vector.broadcast %cst_16 : f32 to vector<128x32xf32>
    %43 = arith.maximumf %41, %42 : vector<128x32xf32>
    %c0_17 = arith.constant 0 : index
    %c0_18 = arith.constant 0 : index
    %44 = vector.load %arg8[%c0_17, %c0_18] : memref<32x128xf32, #tpu.memory_space<vmem>>, vector<32x128xf32>
    %cst_19 = arith.constant dense<0.000000e+00> : vector<128x128xf32>
    %45 = tpu.matmul %43, %44, %cst_19 {dimension_numbers = #tpu.dot_dimension_numbers<[1], [0], [0], [1], [0, 0, 1, 1], [], []>} : vector<128x32xf32>, vector<32x128xf32>, vector<128x128xf32> -> vector<128x128xf32>
    %c0_20 = arith.constant 0 : index
    %c0_21 = arith.constant 0 : index
    %46 = vector.load %arg9[%c0_20, %c0_21] : memref<1x128xf32, #tpu.memory_space<vmem>>, vector<1x128xf32>
    %47 = vector.broadcast %46 : vector<1x128xf32> to vector<128x128xf32>
    %48 = arith.addf %45, %47 : vector<128x128xf32>
    %c0_22 = arith.constant 0 : index
    %c0_23 = arith.constant 0 : index
    %49 = vector.load %arg10[%c0_22, %c0_23] : memref<128x128xf32, #tpu.memory_space<vmem>>, vector<128x128xf32>
    tpu.vector_store %arg10[%c0_22, %c0_23], %48 {strides = array<i32>} : memref<128x128xf32, #tpu.memory_space<vmem>>, vector<128x128xf32>,
    return
  }
  func.func @transform_0(%arg0: i32) -> (i32, i32) {
    %c0_i32 = arith.constant 0 : i32
    %c0_i32_0 = arith.constant 0 : i32
    return %arg0, %c0_i32 : i32, i32
  }
  func.func @transform_1(%arg0: i32) -> (i32, i32) {
    %c0_i32 = arith.constant 0 : i32
    %c0_i32_0 = arith.constant 0 : i32
    %c0_i32_1 = arith.constant 0 : i32
    return %c0_i32, %c0_i32_0 : i32, i32
  }
  func.func @transform_2(%arg0: i32) -> (i32, i32) {
    %c0_i32 = arith.constant 0 : i32
    %c0_i32_0 = arith.constant 0 : i32
    %c0_i32_1 = arith.constant 0 : i32
    return %c0_i32, %c0_i32_0 : i32, i32
  }
  func.func @transform_3(%arg0: i32) -> (i32, i32) {
    %c0_i32 = arith.constant 0 : i32
    %c0_i32_0 = arith.constant 0 : i32
    %c0_i32_1 = arith.constant 0 : i32
    return %c0_i32, %c0_i32_0 : i32, i32
  }
  func.func @transform_4(%arg0: i32) -> (i32, i32) {
    %c0_i32 = arith.constant 0 : i32
    %c0_i32_0 = arith.constant 0 : i32
    %c0_i32_1 = arith.constant 0 : i32
    return %c0_i32, %c0_i32_0 : i32, i32
  }
  func.func @transform_5(%arg0: i32) -> (i32, i32) {
    %c0_i32 = arith.constant 0 : i32
    %c0_i32_0 = arith.constant 0 : i32
    %c0_i32_1 = arith.constant 0 : i32
    return %c0_i32, %c0_i32_0 : i32, i32
  }
  func.func @transform_6(%arg0: i32) -> (i32, i32) {
    %c0_i32 = arith.constant 0 : i32
    %c0_i32_0 = arith.constant 0 : i32
    %c0_i32_1 = arith.constant 0 : i32
    return %c0_i32, %c0_i32_0 : i32, i32
  }
  func.func @transform_7(%arg0: i32) -> (i32, i32) {
    %c0_i32 = arith.constant 0 : i32
    %c0_i32_0 = arith.constant 0 : i32
    %c0_i32_1 = arith.constant 0 : i32
    return %c0_i32, %c0_i32_0 : i32, i32
  }
  func.func @transform_8(%arg0: i32) -> (i32, i32) {
    %c0_i32 = arith.constant 0 : i32
    %c0_i32_0 = arith.constant 0 : i32
    %c0_i32_1 = arith.constant 0 : i32
    return %c0_i32, %c0_i32_0 : i32, i32
  }
  func.func @transform_9(%arg0: i32) -> (i32, i32) {
    %c0_i32 = arith.constant 0 : i32
    %c0_i32_0 = arith.constant 0 : i32
    return %arg0, %c0_i32 : i32, i32
  }
}

</mosaic_0001>

<bundles_post_ra>
// kernel: tpu_custom_call.1
= control target key start
LH: loop header
LB: loop body
LE: loop exit
PB: predicated region body
PF: predicated region fallthrough
CT: control target
= control target key end

     0   :  { %14 = vsyncpa [#allocation3], 0  ;;  %s2459_s0 = inlined_call_operand.vmem [shape: f32[256,4], index: 0, kind: input, shape index: {}]   ;;  %s2460_s1 = inlined_call_operand.vmem [shape: f32[4,32], index: 1, kind: input, shape index: {}]   ;;  %s2461_s2 = inlined_call_operand.vmem [shape: f32[1,32], index: 2, kind: input, shape index: {}]   ;;  %s2462_s3 = inlined_call_operand.vmem [shape: f32[32,128], index: 3, kind: input, shape index: {}]   ;;  %s2463_s4 = inlined_call_operand.vmem [shape: f32[1,128], index: 4, kind: input, shape index: {}]   ;;  %s2464_s5 = inlined_call_operand.vmem [shape: f32[128,32], index: 5, kind: input, shape index: {}]   ;;  %s2465_s6 = inlined_call_operand.vmem [shape: f32[1,32], index: 6, kind: input, shape index: {}]   ;;  %s2466_s7 = inlined_call_operand.vmem [shape: f32[32,128], index: 7, kind: input, shape index: {}]   ;;  %s2467_s8 = inlined_call_operand.vmem [shape: f32[1,128], index: 8, kind: input, shape index: {}]   ;;  %s2468_s9 = inlined_call_operand.hbm [shape: f32[256,128], index: 9, kind: output, shape index: {}]  }
   0x1   :  { %16 = vsyncpa [#allocation3 + $0x1], 0  ;;  %s1985_s30 = smov 0   ;;  %s1987_s10 = smov 0  }
   0x2   :  { %s1989_s11 = smov 0   ;;  %s1991_s12 = smov 0  }
   0x3 LB: > { %s2006_s13 = sadd.s32 4294967295, %s1926_s12   ;;  %s1491_s14 = sadd.s32 4294967294, %s1926_s12   ;;  %s1926_s12 = sphi %s1991_s12, %s2474_s12   ;;  %s1922_s11 = sphi %s1989_s11, %s2473_s11   ;;  %s1918_s10 = sphi %s1987_s10, %s2472_s10   ;;  %s1914_s30 = sphi %s1985_s30, %s2471_s30  }
   0x4   : > { %s2010_s15 = sadd.s32 1, %s1926_s12   ;;  %s223_s16 = sadd.s32 1, %s1922_s11 }
   0x5   : > { %s220_s17 = ssub.s32 %s1926_s12, %s2010_s15  ;;  %p233_p0 = scmp.ne.s32.totalorder %s1922_s11, %s1918_s10 }
   0x6   : > { %p221_p1 = scmp.eq.s32.totalorder %s220_s17, 0  ;;  %p234_p2 = scmp.eq.s32.totalorder %s2006_s13, 1 }
   0x7   : > { %p239_p3 = scmp.ne.s32.totalorder %s1918_s10, %s1914_s30  ;;  %p240_p4 = scmp.eq.s32.totalorder %s1491_s14, 1 }
   0x8   : > { %s2021_s18 = scalar_select %p221_p1, %s1922_s11, %s223_s16  }
   0x9   : > { %p2023_p5 = por %p234_p2, %p233_p0  ;;  %p2027_p6 = por %p240_p4, %p239_p3 }
   0xa   : > { %p1494_p7 = scmp.ge.s32.totalorder %s1926_s12, 1  ;;  %p291_p8 = scmp.lt.s32.totalorder %s1926_s12, 3 }
   0xc   : > { %p292_p9 = pnand %p1494_p7, %p291_p8 }
   0xd   : > { %s1496_s21 = sshll.u32 (!%p292_p9), %s2006_s13, 4  ;;  %v1928_v0 = vmov (!%p292_p9), 3   ;;  %v1929_v1 = vmov (!%p292_p9), 1   ;;  %v1930_v6 = vmov (!%p292_p9), 2   ;;  %v1931_v8 = vmov (!%p292_p9), 0   ;;  %v790_v10 = vld [vmem:[%s2462_s3] sm:$0xff] (!%p292_p9) }
   0xe   : > { %295 = sbr.rel (%p292_p9) target bundleno = 1014 (0x3f6), region = 56  ;;  %1833 = vset.pattern.permute.xlu0 (!%p292_p9), %v1928_v0  ;;  %1829 = vset.pattern.permute.xlu1 (!%p292_p9), %v1929_v1  ;;  %p328_p10 = scmp.lt.s32.totalorder (!%p292_p9), %s1496_s21, 31  ;;  %v791_v11 = vld [vmem:[%s2462_s3 + $0x8] sm:$0xff] (!%p292_p9)  ;;  %v792_v14 = vld [vmem:[%s2462_s3 + $0x10] sm:$0xff] (!%p292_p9)  ;;  %v793_v15 = vld [vmem:[%s2462_s3 + $0x18] sm:$0xff] (!%p292_p9)  ;;  %v432_v27 = vlaneseq (!%p292_p9)  ;;  %vm801_vm0 = vcmask (!%p292_p9), 261120  }
   0xf   : > { %v1732_v12 = vpack.c.bf16 (!%p292_p9), %v791_v11, %v790_v10  ;;  %v1736_v16 = vpack.c.bf16 (!%p292_p9), %v793_v15, %v792_v14  ;;  %v350_v36 = vld [vmem:[%s2460_s1] sm:$0xf] (!%p292_p9)  ;;  %s1539_s27 = sshll.u32 (!%p292_p9), %s2006_s13, 11 }
  0x10   : > { %v433_v30 = vshrl.u32 (!%p292_p9), %v432_v27, 7  ;;  %v2141_v42 = vld [vmem:[%s2461_s2] ss:$0 sm:$0xff] (!%p292_p9)  ;;  %s2410_s16 = scalar_lea.hbm (!%p292_p9), %s2468_s9, %s1539_s27 }
  0x11   : > { %1733 = vmatprep.subr.bf16.mxu0 (!%p292_p9), %v1732_v12 }
  0x12   : > { %1735 = vmatpush3.bf16.msra.mxu0 (!%p292_p9), %v1732_v12  ;;  %v434_v33 = vsub.s32 (!%p292_p9), 0, %v433_v30  ;;  %v540_v34 = vsub.s32 (!%p292_p9), 1, %v433_v30  ;;  %v640_v38 = vsub.s32 (!%p292_p9), 2, %v433_v30  ;;  %v740_v41 = vsub.s32 (!%p292_p9), 3, %v433_v30 }
  0x13   : > { %1737 = vmatprep.subr.bf16.mxu0 (!%p292_p9), %v1736_v16 }
  0x14   : > { %v2133_v39 = vrot.slane (!%p292_p9), %v350_v36, %v434_v33  ;;  %v2136_v40 = vrot.slane (!%p292_p9), %v350_v36, %v540_v34  ;;  %v2143_v44 = vrot.slane (!%p292_p9), %v350_v36, %v640_v38  ;;  %v2148_v48 = vrot.slane (!%p292_p9), %v350_v36, %v740_v41 }
  0x15   : > { %s2476_s21 = smov (!%p328_p10, %s1496_s21), 31 }
  0x16   : > { %s1497_s22 = sshll.u32 %s2476_s21, 3  ;;  %1739 = vmatpush3.bf16.msra.mxu0 %v1736_v16  ;;  %s1932_s21 = smov [#allocation2]  }
  0x17   : > { %s2039_s25 = scalar_lea.vmem %s2459_s0, %s1497_s22  ;;  %s324_s22 = sand.u32 1, %s1918_s10  }
  0x18   : > { %v335_v2 = vld [vmem:[%s2039_s25 + $0x8] sm:$0xff]  ;;  %v334_v3 = vld [vmem:[%s2039_s25] sm:$0xff]  ;;  %v336_v4 = vld [vmem:[%s2039_s25 + $0x10] sm:$0xff]  ;;  %s1495_s23 = sshll.u32 %s324_s22, 7  ;;  %s2418_s17 = scalar_lea.sflag [#allocation3], %s324_s22 }
  0x19   : > { %679 = vperm.xlu0 %1833, %v335_v2   ;;  %475 = vperm.xlu1 %1829, %v334_v3   ;;  %v2045_v5 = vld [vmem:[%s2039_s25 + $0x38] sm:$0xff]  ;;  %v2050_v7 = vld [vmem:[%s2039_s25 + $0x40] sm:$0xff]  ;;  %v339_v17 = vld [vmem:[%s2039_s25 + $0x28] sm:$0xff] }
  0x1a   : > { %v337_v9 = vld [vmem:[%s2039_s25 + $0x18] sm:$0xff]  ;;  %v338_v13 = vld [vmem:[%s2039_s25 + $0x20] sm:$0xff]  ;;  %v340_v18 = vld [vmem:[%s2039_s25 + $0x30] sm:$0xff] }
  0x1b   : > { %v2075_v19 = vld [vmem:[%s2039_s25 + $0x58] sm:$0xff]  ;;  %v2080_v20 = vld [vmem:[%s2039_s25 + $0x60] sm:$0xff]  ;;  %v2096_v21 = vld [vmem:[%s2039_s25 + $0x68] sm:$0xff] }
  0x1c   : > { %v343_v22 = vld [vmem:[%s2039_s25 + $0x48] sm:$0xff]  ;;  %v2103_v23 = vld [vmem:[%s2039_s25 + $0x70] sm:$0xff] }
  0x1d   : > { %683 = vperm.xlu0 %1833, %v336_v4   ;;  %479 = vperm.xlu1 %1829, %v335_v2   ;;  %v344_v24 = vld [vmem:[%s2039_s25 + $0x50] sm:$0xff] }
  0x21   : > { %703 = vperm.xlu0 %1833, %v2045_v5   ;;  %1830 = vset.pattern.permute.xlu1 %v1930_v6 }
  0x22   : > { %575 = vperm.xlu1 %1830, %v334_v3  }
  0x25   : > { %707 = vperm.xlu0 %1833, %v2050_v7  }
  0x26   : > { %579 = vperm.xlu1 %1830, %v335_v2  }
  0x29   : > { %1849 = vset.pattern.permute.xlu0 %v1931_v8 }
  0x2a   : > { %354 = vperm.xlu0 %1849, %v334_v3   ;;  %1831 = vset.pattern.permute.xlu1 %v1928_v0 }
  0x2b   : > { %675 = vperm.xlu1 %1831, %v334_v3  }
  0x2e   : > { %359 = vperm.xlu0 %1849, %v335_v2  }
  0x2f   : > { %1832 = vset.pattern.permute.xlu1 %v1929_v1 }
  0x30   : > { %487 = vperm.xlu1 %1832, %v337_v9  }
  0x32   : > { %364 = vperm.xlu0 %1849, %v336_v4  }
  0x34   : > { %1834 = vset.pattern.permute.xlu1 %v1931_v8 }
  0x35   : > { %374 = vperm.xlu1 %1834, %v338_v13  }
  0x36   : > { %369 = vperm.xlu0 %1849, %v337_v9  }
  0x39   : > { %1835 = vset.pattern.permute.xlu1 %v1930_v6 }
  0x3a   : > { %379 = vperm.xlu0 %1849, %v339_v17   ;;  %583 = vperm.xlu1 %1835, %v336_v4  }
  0x3e   : > { %384 = vperm.xlu0 %1849, %v340_v18   ;;  %587 = vperm.xlu1 %1835, %v337_v9  }
  0x42   : > { %409 = vperm.xlu0 %1849, %v2075_v19   ;;  %1836 = vset.pattern.permute.xlu1 %v1929_v1 }
  0x43   : > { %491 = vperm.xlu1 %1836, %v338_v13  }
  0x46   : > { %414 = vperm.xlu0 %1849, %v2080_v20  }
  0x47   : > { %495 = vperm.xlu1 %1836, %v339_v17  }
  0x4a   : > { %1851 = vset.pattern.permute.xlu0 %v1930_v6 }
  0x4b   : > { %595 = vperm.xlu0 %1851, %v339_v17   ;;  %1837 = vset.pattern.permute.xlu1 %v1928_v0 }
  0x4c   : > { %687 = vperm.xlu1 %1837, %v337_v9  }
  0x4f   : > { %599 = vperm.xlu0 %1851, %v340_v18  }
  0x50   : > { %1838 = vset.pattern.permute.xlu1 %v1930_v6 }
  0x51   : > { %591 = vperm.xlu1 %1838, %v338_v13  }
  0x53   : > { %619 = vperm.xlu0 %1851, %v2075_v19  }
  0x55   : > { %1839 = vset.pattern.permute.xlu1 %v1931_v8 }
  0x56   : > { %389 = vperm.xlu1 %1839, %v2045_v5  }
  0x57   : > { %623 = vperm.xlu0 %1851, %v2080_v20  }
  0x5a   : > { %1840 = vset.pattern.permute.xlu1 %v1929_v1 }
  0x5b   : > { %1857 = vset.pattern.permute.xlu0 %v1929_v1  ;;  %499 = vperm.xlu1 %1840, %v340_v18  }
  0x5c   : > { %483 = vperm.xlu0 %1857, %v336_v4  }
  0x5f   : > { %1841 = vset.pattern.permute.xlu1 %v1928_v0 }
  0x60   : > { %503 = vperm.xlu0 %1857, %v2045_v5   ;;  %691 = vperm.xlu1 %1841, %v338_v13  }
  0x64   : > { %695 = vperm.xlu1 %1841, %v339_v17   ;;  %507 = vperm.xlu0 %1857, %v2050_v7  }
  0x68   : > { %1842 = vset.pattern.permute.xlu1 %v1931_v8  ;;  %527 = vperm.xlu0 %1857, %v2096_v21  }
  0x69   : > { %394 = vperm.xlu1 %1842, %v2050_v7  }
  0x6c   : > { %531 = vperm.xlu0 %1857, %v2103_v23  }
  0x6d   : > { %399 = vperm.xlu1 %1842, %v343_v22  }
  0x70   : > { %1861 = vset.pattern.permute.xlu0 %v1928_v0 }
  0x71   : > { %1843 = vset.pattern.permute.xlu1 %v1930_v6  ;;  %727 = vperm.xlu0 %1861, %v2096_v21  }
  0x72   : > { %603 = vperm.xlu1 %1843, %v2045_v5  }
  0x75   : > { %731 = vperm.xlu0 %1861, %v2103_v23  }
  0x76   : > { %1844 = vset.pattern.permute.xlu1 %v1928_v0 }
  0x77   : > { %699 = vperm.xlu1 %1844, %v340_v18  }
  0x7b   : > { %1845 = vset.pattern.permute.xlu1 %v1929_v1 }
  0x7c   : > { %511 = vperm.xlu1 %1845, %v343_v22  }
  0x80   : > { %1846 = vset.pattern.permute.xlu1 %v1931_v8 }
  0x81   : > { %404 = vperm.xlu1 %1846, %v344_v24  }
  0x85   : > { %1847 = vset.pattern.permute.xlu1 %v1930_v6 }
  0x86   : > { %607 = vperm.xlu1 %1847, %v2050_v7   ;;  %v349_v7 = vld [vmem:[%s2039_s25 + $0x78] sm:$0xff]  ;;  %s2389_s25 = scalar_lea.vmem [#allocation2], %s1495_s23  ;;  %s1868_s23 = sshll.u32 %s1932_s21, 4  ;;  %s1869_s23 = int_to_ptr.vmem [resolvable:$false] %s1868_s23 }
  0x87   : > { %s1429_s28 = sshll.u32 %s2389_s25, 4  ;;  %s1870_s24 = scalar_lea.vmem %s1869_s23, 4096  ;;  %s2412_s28 = int_to_ptr.vmem [resolvable:$true] %s1429_s28 }
  0x88   : > { %s1864_s13 = scalar_lea.vmem %s2412_s28, 2048  ;;  %p1871_p0 = scmp.lt.s32.totalorder %s2412_s28, %s1869_s23 }
  0x89   : > { %p1865_p11 = scmp.ne.s32.totalorder %s2412_s28, %s1864_s13  ;;  %p1872_p1 = scmp.lt.s32.totalorder %s1870_s24, %s1864_s13 }
  0x8a   : > { %611 = vperm.xlu1 %1847, %v343_v22  }
  0x8b   : > { %p1866_p12 = pnand %p1865_p11, %p2023_p5  ;;  %p1873_p2 = por %p1872_p1, %p1871_p0 }
  0x8d   : > { %p1867_p13 = pneg %p1866_p12 }
  0x8e   : > { %1848 = vset.pattern.permute.xlu1 %v1929_v1 }
  0x8f   : > { %515 = vperm.xlu1 %1848, %v344_v24   ;;  %p1874_p3 = pnand %p1873_p2, %p1867_p13 }
  0x93   : > { %519 = vperm.xlu1 %1848, %v2075_v19  }
  0x97   : > { %1850 = vset.pattern.permute.xlu1 %v1928_v0 }
  0x98   : > { %711 = vperm.xlu1 %1850, %v343_v22   ;;  %v476_v25 = vpop.permute.xlu1 %475  ;;  %v680_v26 = vpop.permute.xlu0 %679 }
  0x99   : > { %v542_v47 = vmul.f32 %v2136_v40, %v476_v25  ;;  %v743_v60 = vmul.f32 %v2148_v48, %v680_v26 }
  0x9c   : > { %1852 = vset.pattern.permute.xlu1 %v1930_v6  ;;  %v480_v28 = vpop.permute.xlu1 %479  ;;  %v2121_v29 = vpop.permute.xlu0 %683 }
  0x9d   : > { %615 = vperm.xlu1 %1852, %v344_v24   ;;  %v543_v55 = vmul.f32 %v2136_v40, %v480_v28 }
  0xa0   : > { %v2123_v31 = vpop.permute.xlu0 %703 }
  0xa1   : > { %1853 = vset.pattern.permute.xlu1 %v1931_v8  ;;  %v576_v32 = vpop.permute.xlu1 %575 }
  0xa2   : > { %419 = vperm.xlu1 %1853, %v2096_v21   ;;  %v642_v51 = vmul.f32 %v2143_v44, %v576_v32 }
  0xa4   : > { %v2127_v35 = vpop.permute.xlu0 %707 }
  0xa5   : > { %v580_v37 = vpop.permute.xlu1 %579 }
  0xa6   : > { %1854 = vset.pattern.permute.xlu1 %v1929_v1  ;;  %v643_v61 = vmul.f32 %v2143_v44, %v580_v37 }
  0xa7   : > { %523 = vperm.xlu1 %1854, %v2080_v20  }
  0xa9   : > { %v355_v43 = vpop.permute.xlu0 %354 }
  0xaa   : > { %v436_v45 = vmul.f32 %v2133_v39, %v355_v43  ;;  %v676_v46 = vpop.permute.xlu1 %675 }
  0xab   : > { %1855 = vset.pattern.permute.xlu1 %v1928_v0  ;;  %v742_v56 = vmul.f32 %v2148_v48, %v676_v46  ;;  %v1013_v46 = vld [vmem:[%s2464_s5 + $0x10] sm:$0xff] }
  0xac   : > { %v458_v49 = vadd.f32 %v2141_v42, %v436_v45  ;;  %715 = vperm.xlu1 %1855, %v344_v24   ;;  %v1011_v45 = vld [vmem:[%s2464_s5] sm:$0xff] }
  0xad   : > { %v360_v50 = vpop.permute.xlu0 %359 }
  0xae   : > { %v558_v52 = vadd.f32 %v542_v47, %v458_v49  ;;  %v437_v53 = vmul.f32 %v2133_v39, %v360_v50 }
  0xaf   : > { %v488_v54 = vpop.permute.xlu1 %487 }
  0xb0   : > { %v459_v57 = vadd.f32 %v2141_v42, %v437_v53  ;;  %719 = vperm.xlu1 %1855, %v2075_v19   ;;  %v658_v58 = vadd.f32 %v642_v51, %v558_v52  ;;  %v545_v33 = vmul.f32 %v2136_v40, %v488_v54  ;;  %v1014_v52 = vld [vmem:[%s2464_s5 + $0x18] sm:$0xff] }
  0xb1   : > { %v365_v59 = vpop.permute.xlu0 %364 }
  0xb2   : > { %v559_v62 = vadd.f32 %v543_v55, %v459_v57  ;;  %v758_v63 = vadd.f32 %v742_v56, %v658_v58  ;;  %v1744_v56 = vpack.c.bf16 %v1014_v52, %v1013_v46  ;;  %v1015_v57 = vld [vmem:[%s2464_s5 + $0x20] sm:$0xff]  ;;  %v1016_v58 = vld [vmem:[%s2464_s5 + $0x28] sm:$0xff] }
  0xb4   : > { %v659_v2 = vadd.f32 %v643_v61, %v559_v62  ;;  %1856 = vset.pattern.permute.xlu1 %v1931_v8  ;;  %v375_v3 = vpop.permute.xlu1 %374  ;;  %v774_v4 = vmax.f32 %v758_v63, 0.0 }
  0xb5   : > { %v370_v5 = vpop.permute.xlu0 %369  ;;  %424 = vperm.xlu1 %1856, %v2103_v23  }
  0xb6   : > { %1620 = vmatprep.mubr.msk.f32.mxu0 %vm801_vm0, %v774_v4  ;;  %v759_v9 = vadd.f32 %v743_v60, %v659_v2  ;;  %v1748_v4 = vpack.c.bf16 %v1016_v58, %v1015_v57 }
  0xb8   : > { %v775_v10 = vmax.f32 %v759_v9, 0.0 }
  0xb9   : > { %429 = vperm.xlu1 %1856, %v349_v7   ;;  %v584_v11 = vpop.permute.xlu1 %583  ;;  %v380_v12 = vpop.permute.xlu0 %379 }
  0xba   : > { %1621 = vmatmul.mubr.msk.f32.vlgmr.msra.gmra.mrb[0].mxu0 %vm801_vm0, %v775_v10  ;;  %v441_v27 = vmul.f32 %v2133_v39, %v380_v12  ;;  %v644_v38 = vmul.f32 %v2143_v44, %v584_v11  ;;  %v1017_v10 = vld [vmem:[%s2464_s5 + $0x30] sm:$0xff]  ;;  %v1018_v11 = vld [vmem:[%s2464_s5 + $0x38] sm:$0xff] }
  0xbc   : > { %v463_v47 = vadd.f32 %v2141_v42, %v441_v27 }
  0xbd   : > { %1858 = vset.pattern.permute.xlu1 %v1930_v6  ;;  %v588_v13 = vpop.permute.xlu1 %587  ;;  %v2165_v14 = vpop.permute.xlu0 %384 }
  0xbe   : > { %627 = vperm.xlu1 %1858, %v2096_v21   ;;  %v645_v34 = vmul.f32 %v2143_v44, %v588_v13 }
  0xc1   : > { %v2168_v8 = vpop.permute.xlu0 %409 }
  0xc2   : > { %1859 = vset.pattern.permute.xlu1 %v1928_v0  ;;  %v492_v15 = vpop.permute.xlu1 %491 }
  0xc3   : > { %723 = vperm.xlu1 %1859, %v2080_v20   ;;  %v439_v20 = vmul.f32 %v2133_v39, %v370_v5  ;;  %v546_v30 = vmul.f32 %v2136_v40, %v492_v15 }
  0xc5   : > { %v2172_v16 = vpop.permute.xlu0 %414 }
  0xc6   : > { %v496_v17 = vpop.permute.xlu1 %495 }
  0xc7   : > { %1860 = vset.pattern.permute.xlu1 %v1929_v1  ;;  %v438_v1 = vmul.f32 %v2133_v39, %v365_v59  ;;  %v547_v54 = vmul.f32 %v2136_v40, %v496_v17 }
  0xc8   : > { %535 = vperm.xlu1 %1860, %v349_v7  }
  0xc9   : > { %v460_v28 = vadd.f32 %v2141_v42, %v438_v1  ;;  %v563_v5 = vadd.f32 %v547_v54, %v463_v47  ;;  %v1019_v1 = vld [vmem:[%s2464_s5 + $0x40] sm:$0xff] }
  0xca   : > { %v596_v18 = vpop.permute.xlu0 %595 }
  0xcb   : > { %v688_v19 = vpop.permute.xlu1 %687  ;;  %v647_v61 = vmul.f32 %v2143_v44, %v596_v18 }
  0xcc   : > { %1862 = vset.pattern.permute.xlu1 %v1930_v6  ;;  %v440_v6 = vmul.f32 %v2133_v39, %v375_v3  ;;  %v745_v50 = vmul.f32 %v2148_v48, %v688_v19  ;;  %v1752_v19 = vpack.c.bf16 %v1018_v11, %v1017_v10 }
  0xcd   : > { %631 = vperm.xlu1 %1862, %v2103_v23   ;;  %v461_v23 = vadd.f32 %v2141_v42, %v439_v20  ;;  %v663_v13 = vadd.f32 %v647_v61, %v563_v5 }
  0xce   : > { %v2177_v21 = vpop.permute.xlu0 %599  ;;  %v462_v37 = vadd.f32 %v2141_v42, %v440_v6  ;;  %v1020_v6 = vld [vmem:[%s2464_s5 + $0x48] sm:$0xff] }
  0xcf   : > { %v561_v49 = vadd.f32 %v545_v33, %v461_v23  ;;  %v442_v33 = vmul.f32 %v2133_v39, %v2165_v14  ;;  %v1024_v14 = vld [vmem:[%s2464_s5 + $0x68] sm:$0xff] }
  0xd0   : > { %v592_v22 = vpop.permute.xlu1 %591  ;;  %v562_v53 = vadd.f32 %v546_v30, %v462_v37  ;;  %v1021_v30 = vld [vmem:[%s2464_s5 + $0x50] sm:$0xff] }
  0xd1   : > { %635 = vperm.xlu1 %1862, %v349_v7   ;;  %v646_v41 = vmul.f32 %v2143_v44, %v592_v22  ;;  %v661_v59 = vadd.f32 %v645_v34, %v561_v49 }
  0xd2   : > { %v2179_v24 = vpop.permute.xlu0 %619 }
  0xd3   : > { %v662_v62 = vadd.f32 %v646_v41, %v562_v53  ;;  %v761_v3 = vadd.f32 %v745_v50, %v661_v59  ;;  %v749_v53 = vmul.f32 %v2148_v48, %v2123_v31 }
  0xd5   : > { %1863 = vset.pattern.permute.xlu1 %v1928_v0  ;;  %v2183_v25 = vpop.permute.xlu1 %389  ;;  %v744_v0 = vmul.f32 %v2148_v48, %v2121_v29  ;;  %v1012_v29 = vld [vmem:[%s2464_s5 + $0x8] sm:$0xff]  ;;  %v777_v18 = vmax.f32 %v761_v3, 0.0 }
  0xd6   : > { %735 = vperm.xlu1 %1863, %v349_v7   ;;  %v2186_v26 = vpop.permute.xlu0 %623  ;;  %v1740_v51 = vpack.c.bf16 %v1012_v29, %v1011_v45  ;;  %v464_v45 = vadd.f32 %v2141_v42, %v442_v33 }
  0xd8   : > { %1741 = vmatprep.subr.bf16.mxu1 %v1740_v51 }
  0xd9   : > { %1743 = vmatpush3.bf16.msra.mxu1 %v1740_v51  ;;  %v648_v51 = vmul.f32 %v2143_v44, %v2177_v21 }
  0xda   : > { %v2193_v32 = vpop.permute.xlu1 %499  ;;  %1745 = vmatprep.subr.bf16.mxu1 %v1744_v56 }
  0xdb   : > { %v484_v36 = vpop.permute.xlu0 %483  ;;  %v548_v29 = vmul.f32 %v2136_v40, %v2193_v32 }
  0xdc   : > { %v544_v43 = vmul.f32 %v2136_v40, %v484_v36  ;;  %v443_v36 = vmul.f32 %v2133_v39, %v2183_v25 }
  0xdd   : > { %1747 = vmatpush3.bf16.msra.mxu1 %v1744_v56  ;;  %v564_v52 = vadd.f32 %v548_v29, %v464_v45 }
  0xde   : > { %v560_v55 = vadd.f32 %v544_v43, %v460_v28  ;;  %1749 = vmatprep.subr.bf16.mxu1 %v1748_v4  ;;  %v1756_v28 = vpack.c.bf16 %v1020_v6, %v1019_v1  ;;  %v1023_v43 = vld [vmem:[%s2464_s5 + $0x60] sm:$0xff]  ;;  %v465_v25 = vadd.f32 %v2141_v42, %v443_v36  ;;  %v653_v6 = vmul.f32 %v2143_v44, %v2179_v24 }
  0xdf   : > { %v692_v60 = vpop.permute.xlu1 %691  ;;  %v504_v34 = vpop.permute.xlu0 %503  ;;  %v1764_v47 = vpack.c.bf16 %v1024_v14, %v1023_v43  ;;  %v448_v24 = vmul.f32 %v2133_v39, %v2172_v16 }
  0xe0   : > { %v660_v63 = vadd.f32 %v644_v38, %v560_v55  ;;  %v746_v2 = vmul.f32 %v2148_v48, %v692_v60  ;;  %v549_v41 = vmul.f32 %v2136_v40, %v504_v34  ;;  %v664_v55 = vadd.f32 %v648_v51, %v564_v52 }
  0xe1   : > { %1751 = vmatpush3.bf16.msra.mxu1 %v1748_v4 }
  0xe2   : > { %v760_v7 = vadd.f32 %v744_v0, %v660_v63  ;;  %v762_v9 = vadd.f32 %v746_v2, %v662_v62  ;;  %1753 = vmatprep.subr.bf16.mxu1 %v1752_v19  ;;  %v1022_v0 = vld [vmem:[%s2464_s5 + $0x58] sm:$0xff]  ;;  %v565_v49 = vadd.f32 %v549_v41, %v465_v25  ;;  %v470_v25 = vadd.f32 %v2141_v42, %v448_v24 }
  0xe3   : > { %v696_v12 = vpop.permute.xlu1 %695  ;;  %v1760_v38 = vpack.c.bf16 %v1022_v0, %v1021_v30  ;;  %v508_v31 = vpop.permute.xlu0 %507 }
  0xe4   : > { %v776_v15 = vmax.f32 %v760_v7, 0.0  ;;  %v747_v17 = vmul.f32 %v2148_v48, %v696_v12  ;;  %v778_v22 = vmax.f32 %v762_v9, 0.0  ;;  %v550_v2 = vmul.f32 %v2136_v40, %v508_v31 }
  0xe5   : > { %1755 = vmatpush3.bf16.msra.mxu1 %v1752_v19  ;;  %v750_v7 = vmul.f32 %v2148_v48, %v2127_v35  ;;  %v447_v19 = vmul.f32 %v2133_v39, %v2168_v8 }
  0xe6   : > { %v763_v20 = vadd.f32 %v747_v17, %v663_v13  ;;  %1623 = vmatprep.mubr.msk.f32.mxu0 %vm801_vm0, %v776_v15  ;;  %1757 = vmatprep.subr.bf16.mxu1 %v1756_v28  ;;  %v1025_v13 = vld [vmem:[%s2464_s5 + $0x70] sm:$0xff]  ;;  %v1026_v15 = vld [vmem:[%s2464_s5 + $0x78] sm:$0xff] }
  0xe7   : > { %1624 = vmatmul.mubr.msk.f32.gmra.mrb[2].mxu0 %vm801_vm0, %v777_v18  ;;  %v1768_v18 = vpack.c.bf16 %v1026_v15, %v1025_v13  ;;  %v469_v1 = vadd.f32 %v2141_v42, %v447_v19 }
  0xe8   : > { %v779_v23 = vmax.f32 %v763_v20, 0.0  ;;  %1626 = vmatprep.mubr.msk.f32.mxu0 %vm801_vm0, %v778_v22  ;;  %v395_v27 = vpop.permute.xlu1 %394 }
  0xe9   : > { %1759 = vmatpush3.bf16.msra.mxu1 %v1756_v28  ;;  %v444_v21 = vmul.f32 %v2133_v39, %v395_v27 }
  0xea   : > { %1761 = vmatprep.subr.bf16.mxu1 %v1760_v38 }
  0xeb   : > { %1627 = vmatmul.mubr.msk.f32.gmra.mrb[4].mxu0 %vm801_vm0, %v779_v23  ;;  %v466_v63 = vadd.f32 %v2141_v42, %v444_v21 }
  0xec   : > { %v400_v37 = vpop.permute.xlu1 %399 }
  0xed   : > { %1763 = vmatpush3.bf16.msra.mxu1 %v1760_v38  ;;  %v566_v4 = vadd.f32 %v550_v2, %v466_v63  ;;  %v445_v35 = vmul.f32 %v2133_v39, %v400_v37 }
  0xee   : > { %1765 = vmatprep.subr.bf16.mxu1 %v1764_v47 }
  0xef   : > { %v467_v27 = vadd.f32 %v2141_v42, %v445_v35 }
  0xf1   : > { %v604_v46 = vpop.permute.xlu1 %603  ;;  %1767 = vmatpush3.bf16.msra.mxu1 %v1764_v47 }
  0xf2   : > { %v649_v50 = vmul.f32 %v2143_v44, %v604_v46  ;;  %1769 = vmatprep.subr.bf16.mxu1 %v1768_v18  ;;  %v654_v46 = vmul.f32 %v2143_v44, %v2186_v26 }
  0xf4   : > { %v665_v54 = vadd.f32 %v649_v50, %v565_v49 }
  0xf5   : > { %1771 = vmatpush3.bf16.msra.mxu1 %v1768_v18 }
  0xf6   : > { %v700_v32 = vpop.permute.xlu1 %699  ;;  %v765_v57 = vadd.f32 %v749_v53, %v665_v54 }
  0xf7   : > { %v748_v56 = vmul.f32 %v2148_v48, %v700_v32 }
  0xf8   : > { %v781_v61 = vmax.f32 %v765_v57, 0.0 }
  0xf9   : > { %v764_v58 = vadd.f32 %v748_v56, %v664_v55 }
  0xfb   : > { %v780_v59 = vmax.f32 %v764_v58, 0.0  ;;  %v512_v60 = vpop.permute.xlu1 %511 }
  0xfc   : > { %v551_v22 = vmul.f32 %v2136_v40, %v512_v60 }
  0xfd   : > { %1629 = vmatprep.mubr.msk.f32.mxu0 %vm801_vm0, %v780_v59 }
  0xfe   : > { %1630 = vmatmul.mubr.msk.f32.gmra.mrb[6].mxu0 %vm801_vm0, %v781_v61  ;;  %v567_v8 = vadd.f32 %v551_v22, %v467_v27  ;;  %v528_v61 = vpop.permute.xlu0 %527 }
  0xff   : > { %v555_v2 = vmul.f32 %v2136_v40, %v528_v61 }
 0x100   : > { %v405_v62 = vpop.permute.xlu1 %404 }
 0x101   : > { %v446_v14 = vmul.f32 %v2133_v39, %v405_v62 }
 0x102   : > { %v532_v62 = vpop.permute.xlu0 %531 }
 0x103   : > { %v468_v49 = vadd.f32 %v2141_v42, %v446_v14 }
 0x105   : > { %v608_v3 = vpop.permute.xlu1 %607 }
 0x106   : > { %v650_v5 = vmul.f32 %v2143_v44, %v608_v3 }
 0x108   : > { %v666_v9 = vadd.f32 %v650_v5, %v566_v4  ;;  %v728_v4 = vpop.permute.xlu0 %727 }
 0x109   : > { %v612_v10 = vpop.permute.xlu1 %611 }
 0x10a   : > { %v766_v11 = vadd.f32 %v750_v7, %v666_v9  ;;  %v651_v28 = vmul.f32 %v2143_v44, %v612_v10  ;;  %v755_v10 = vmul.f32 %v2148_v48, %v728_v4 }
 0x10c   : > { %v782_v12 = vmax.f32 %v766_v11, 0.0  ;;  %v667_v34 = vadd.f32 %v651_v28, %v567_v8 }
 0x10e   : > { %1632 = vmatprep.mubr.msk.f32.mxu0 %vm801_vm0, %v782_v12  ;;  %v516_v17 = vpop.permute.xlu1 %515 }
 0x10f   : > { %v552_v45 = vmul.f32 %v2136_v40, %v516_v17 }
 0x111   : > { %v568_v52 = vadd.f32 %v552_v45, %v468_v49  ;;  %v1196_v49 = vld [vmem:[%s2466_s7 + $0x8] sm:$0xff] }
 0x112   : > { %v520_v20 = vpop.permute.xlu1 %519 }
 0x113   : > { %v553_v23 = vmul.f32 %v2136_v40, %v520_v20  ;;  %v556_v20 = vmul.f32 %v2136_v40, %v532_v62 }
 0x115   : > { %v569_v30 = vadd.f32 %v553_v23, %v469_v1  ;;  %v732_v1 = vpop.permute.xlu0 %731 }
 0x116   : > { %v756_v28 = vmul.f32 %v2148_v48, %v732_v1 }
 0x117   : > { %v712_v0 = vpop.permute.xlu1 %711  ;;  %v669_v33 = vadd.f32 %v653_v6, %v569_v30 }
 0x118   : > { %v751_v36 = vmul.f32 %v2148_v48, %v712_v0 }
 0x11a   : > { %v767_v37 = vadd.f32 %v751_v36, %v667_v34 }
 0x11c   : > { %v783_v38 = vmax.f32 %v767_v37, 0.0  ;;  %v616_v41 = vpop.permute.xlu1 %615 }
 0x11d   : > { %v652_v50 = vmul.f32 %v2143_v44, %v616_v41 }
 0x11e   : > { %1633 = vmatmul.mubr.msk.f32.gmra.mrb[8].mxu0 %vm801_vm0, %v783_v38 }
 0x11f   : > { %v668_v54 = vadd.f32 %v652_v50, %v568_v52 }
 0x121   : > { %v420_v43 = vpop.permute.xlu1 %419 }
 0x122   : > { %v449_v21 = vmul.f32 %v2133_v39, %v420_v43 }
 0x124   : > { %v471_v63 = vadd.f32 %v2141_v42, %v449_v21 }
 0x126   : > { %v524_v29 = vpop.permute.xlu1 %523  ;;  %v571_v5 = vadd.f32 %v555_v2, %v471_v63  ;;  %v1197_v2 = vld [vmem:[%s2466_s7 + $0x10] sm:$0xff] }
 0x127   : > { %v554_v47 = vmul.f32 %v2136_v40, %v524_v29 }
 0x129   : > { %v570_v51 = vadd.f32 %v554_v47, %v470_v25 }
 0x12b   : > { %v716_v53 = vpop.permute.xlu1 %715  ;;  %v670_v16 = vadd.f32 %v654_v46, %v570_v51 }
 0x12c   : > { %v752_v32 = vmul.f32 %v2148_v48, %v716_v53 }
 0x12e   : > { %v768_v55 = vadd.f32 %v752_v32, %v668_v54 }
 0x12f   : > { %v720_v56 = vpop.permute.xlu1 %719 }
 0x130   : > { %v784_v57 = vmax.f32 %v768_v55, 0.0  ;;  %v753_v58 = vmul.f32 %v2148_v48, %v720_v56 }
 0x132   : > { %v769_v59 = vadd.f32 %v753_v58, %v669_v33  ;;  %1635 = vmatprep.mubr.msk.f32.mxu0 %vm801_vm0, %v784_v57 }
 0x134   : > { %v785_v26 = vmax.f32 %v769_v59, 0.0  ;;  %v425_v60 = vpop.permute.xlu1 %424 }
 0x135   : > { %v450_v15 = vmul.f32 %v2133_v39, %v425_v60 }
 0x136   : > { %1636 = vmatmul.mubr.msk.f32.gmra.mrb[10].mxu0 %vm801_vm0, %v785_v26 }
 0x137   : > { %v472_v22 = vadd.f32 %v2141_v42, %v450_v15 }
 0x138   : > { %v430_v31 = vpop.permute.xlu1 %429 }
 0x139   : > { %v572_v23 = vadd.f32 %v556_v20, %v472_v22  ;;  %v451_v30 = vmul.f32 %v2133_v39, %v430_v31  ;;  %v2334_v39 = vld [vmem:[%s2463_s4] ss:$0 sm:$0xff] }
 0x13b   : > { %v473_v36 = vadd.f32 %v2141_v42, %v451_v30 }
 0x13d   : > { %v628_v3 = vpop.permute.xlu1 %627 }
 0x13e   : > { %v655_v7 = vmul.f32 %v2143_v44, %v628_v3  ;;  %v1198_v3 = vld [vmem:[%s2466_s7 + $0x18] sm:$0xff] }
 0x13f   : > { %v1776_v4 = vpack.c.bf16 %v1198_v3, %v1197_v2 }
 0x140   : > { %v671_v9 = vadd.f32 %v655_v7, %v571_v5 }
 0x142   : > { %v724_v11 = vpop.permute.xlu1 %723  ;;  %v771_v13 = vadd.f32 %v755_v10, %v671_v9 }
 0x143   : > { %v754_v12 = vmul.f32 %v2148_v48, %v724_v11 }
 0x144   : > { %v787_v35 = vmax.f32 %v771_v13, 0.0 }
 0x145   : > { %v770_v17 = vadd.f32 %v754_v12, %v670_v16 }
 0x147   : > { %v786_v18 = vmax.f32 %v770_v17, 0.0  ;;  %v536_v19 = vpop.permute.xlu1 %535 }
 0x148   : > { %v557_v0 = vmul.f32 %v2136_v40, %v536_v19 }
 0x149   : > { %1638 = vmatprep.mubr.msk.f32.mxu0 %vm801_vm0, %v786_v18 }
 0x14a   : > { %1639 = vmatmul.mubr.msk.f32.gmra.mrb[12].mxu0 %vm801_vm0, %v787_v35  ;;  %v573_v41 = vadd.f32 %v557_v0, %v473_v36  ;;  %v1516_v36 = vld [vmem:[%s2465_s6] ss:$0 sm:$0xff] }
 0x14c   : > { %v632_v6 = vpop.permute.xlu1 %631 }
 0x14d   : > { %v656_v27 = vmul.f32 %v2143_v44, %v632_v6 }
 0x14f   : > { %v672_v8 = vadd.f32 %v656_v27, %v572_v23 }
 0x150   : > { %v636_v33 = vpop.permute.xlu1 %635 }
 0x151   : > { %v772_v34 = vadd.f32 %v756_v28, %v672_v8  ;;  %v657_v37 = vmul.f32 %v2143_v44, %v636_v33 }
 0x153   : > { %v788_v38 = vmax.f32 %v772_v34, 0.0  ;;  %v673_v24 = vadd.f32 %v657_v37, %v573_v41 }
 0x155   : > { %1641 = vmatprep.mubr.msk.f32.mxu0 %vm801_vm0, %v788_v38  ;;  %v736_v43 = vpop.permute.xlu1 %735 }
 0x156   : > { %v757_v14 = vmul.f32 %v2148_v48, %v736_v43  ;;  %v1195_v48 = vld [vmem:[%s2466_s7] sm:$0xff] }
 0x157   : > { %v1772_v50 = vpack.c.bf16 %v1196_v49, %v1195_v48 }
 0x158   : > { %v773_v45 = vadd.f32 %v757_v14, %v673_v24 }
 0x159   : > { %1773 = vmatprep.subr.bf16.mxu0 %v1772_v50  ;;  %1780 = vmatprep.subr.bf16.mxu1 %v1772_v50 }
 0x15a   : > { %v789_v29 = vmax.f32 %v773_v45, 0.0  ;;  %1775 = vmatpush3.bf16.msra.mxu0 %v1772_v50 }
 0x15b   : > { %1777 = vmatprep.subr.bf16.mxu0 %v1776_v4 }
 0x15c   : > { %1642 = vmatmul.mubr.msk.f32.gmra.mrb[14].mxu0 %vm801_vm0, %v789_v29 }
 0x15e   : > { %1779 = vmatpush3.bf16.msra.mxu0 %v1776_v4 }
 0x18d   : > { %v1622_v40 = vpop.f32.mrb[0].mxu0 }
 0x18e   : > { %v922_v42 = vadd.f32 %v1622_v40, %v2334_v39  ;;  %v916_v44 = vpop.f32.mrb[1].mxu0 }
 0x18f   : > { %v917_v25 = vadd.f32 %v2334_v39, %v916_v44 }
 0x190   : > { %v996_v47 = vmax.f32 %v922_v42, 0.0 }
 0x191   : > { %v995_v46 = vmax.f32 %v917_v25, 0.0 }
 0x193   : > { %1676 = vmatprep.mubr.f32.mxu1 %v995_v46 }
 0x194   : > { %1677 = vmatmul.mubr.f32.vlgmr.msra.gmra.mrb[0].mxu1 %v996_v47 }
 0x195   : > { %1782 = vmatpush3.bf16.msra.mxu1 %v1772_v50 }
 0x196   : > { %1781 = vmatprep.subr.bf16.mxu1 %v1776_v4 }
 0x199   : > { %1783 = vmatpush3.bf16.msra.mxu1 %v1776_v4 }
 0x1ba   : > { %v1625_v51 = vpop.f32.mrb[2].mxu0 }
 0x1bb   : > { %v932_v52 = vadd.f32 %v1625_v51, %v2334_v39  ;;  %v926_v53 = vpop.f32.mrb[3].mxu0 }
 0x1bc   : > { %v927_v16 = vadd.f32 %v2334_v39, %v926_v53 }
 0x1bd   : > { %v998_v55 = vmax.f32 %v932_v52, 0.0 }
 0x1be   : > { %v997_v54 = vmax.f32 %v927_v16, 0.0  ;;  %v1628_v32 = vpop.f32.mrb[4].mxu0 }
 0x1bf   : > { %v942_v56 = vadd.f32 %v1628_v32, %v2334_v39  ;;  %v936_v57 = vpop.f32.mrb[5].mxu0 }
 0x1c0   : > { %v937_v58 = vadd.f32 %v2334_v39, %v936_v57  ;;  %1679 = vmatprep.mubr.f32.mxu1 %v997_v54 }
 0x1c1   : > { %1680 = vmatmul.mubr.f32.gmra.mrb[2].mxu1 %v998_v55  ;;  %v1000_v26 = vmax.f32 %v942_v56, 0.0 }
 0x1c2   : > { %v999_v59 = vmax.f32 %v937_v58, 0.0 }
 0x1c4   : > { %1682 = vmatprep.mubr.f32.mxu1 %v999_v59 }
 0x1c5   : > { %1683 = vmatmul.mubr.f32.gmra.mrb[4].mxu1 %v1000_v26 }
 0x1d1   : > { %v1631_v60 = vpop.f32.mrb[6].mxu0 }
 0x1d2   : > { %v952_v61 = vadd.f32 %v1631_v60, %v2334_v39  ;;  %v946_v21 = vpop.f32.mrb[7].mxu0 }
 0x1d3   : > { %v947_v31 = vadd.f32 %v2334_v39, %v946_v21 }
 0x1d4   : > { %v1002_v63 = vmax.f32 %v952_v61, 0.0 }
 0x1d5   : > { %v1001_v62 = vmax.f32 %v947_v31, 0.0 }
 0x1d7   : > { %1685 = vmatprep.mubr.f32.mxu1 %v1001_v62 }
 0x1d8   : > { %1686 = vmatmul.mubr.f32.gmra.mrb[6].mxu1 %v1002_v63 }
 0x1f1   : > { %v1634_v5 = vpop.f32.mrb[8].mxu0 }
 0x1f2   : > { %v962_v7 = vadd.f32 %v1634_v5, %v2334_v39  ;;  %v956_v9 = vpop.f32.mrb[9].mxu0 }
 0x1f3   : > { %v957_v10 = vadd.f32 %v2334_v39, %v956_v9 }
 0x1f4   : > { %v1004_v12 = vmax.f32 %v962_v7, 0.0 }
 0x1f5   : > { %v1003_v11 = vmax.f32 %v957_v10, 0.0 }
 0x1f7   : > { %1688 = vmatprep.mubr.f32.mxu1 %v1003_v11 }
 0x1f8   : > { %1689 = vmatmul.mubr.f32.gmra.mrb[8].mxu1 %v1004_v12 }
 0x209   : > { %v1637_v13 = vpop.f32.mrb[10].mxu0 }
 0x20a   : > { %v972_v15 = vadd.f32 %v1637_v13, %v2334_v39  ;;  %v966_v17 = vpop.f32.mrb[11].mxu0 }
 0x20b   : > { %v967_v18 = vadd.f32 %v2334_v39, %v966_v17 }
 0x20c   : > { %v1006_v35 = vmax.f32 %v972_v15, 0.0 }
 0x20d   : > { %v1005_v19 = vmax.f32 %v967_v18, 0.0  ;;  %v1517_v18 = vld [vmem:[%s2467_s8] ss:$0 sm:$0xff] }
 0x20f   : > { %1691 = vmatprep.mubr.f32.mxu1 %v1005_v19 }
 0x210   : > { %1692 = vmatmul.mubr.f32.gmra.mrb[10].mxu1 %v1006_v35 }
 0x21d   : > { %v1640_v22 = vpop.f32.mrb[12].mxu0 }
 0x21e   : > { %v982_v20 = vadd.f32 %v1640_v22, %v2334_v39  ;;  %v976_v1 = vpop.f32.mrb[13].mxu0 }
 0x21f   : > { %v977_v6 = vadd.f32 %v2334_v39, %v976_v1 }
 0x220   : > { %v1008_v27 = vmax.f32 %v982_v20, 0.0 }
 0x221   : > { %v1007_v23 = vmax.f32 %v977_v6, 0.0 }
 0x223   : > { %1694 = vmatprep.mubr.f32.mxu1 %v1007_v23 }
 0x224   : > { %1695 = vmatmul.mubr.f32.gmra.mrb[12].mxu1 %v1008_v27 }
 0x22f   : > { %v1643_v28 = vpop.f32.mrb[14].mxu0 }
 0x230   : > { %v992_v30 = vadd.f32 %v1643_v28, %v2334_v39  ;;  %v986_v8 = vpop.f32.mrb[15].mxu0 }
 0x231   : > { %v987_v0 = vadd.f32 %v2334_v39, %v986_v8 }
 0x232   : > { %v1010_v34 = vmax.f32 %v992_v30, 0.0 }
 0x233   : > { %v1009_v33 = vmax.f32 %v987_v0, 0.0 }
 0x235   : > { %1697 = vmatprep.mubr.f32.mxu1 %v1009_v33 }
 0x236   : > { %1698 = vmatmul.mubr.f32.gmra.mrb[14].mxu1 %v1010_v34 }
 0x267   : > { %v1678_v37 = vpop.f32.mrb[0].mxu1 }
 0x268   : > { %v1106_v38 = vadd.f32 %v1678_v37, %v1516_v36  ;;  %v1100_v41 = vpop.f32.mrb[1].mxu1 }
 0x269   : > { %v1101_v43 = vadd.f32 %v1516_v36, %v1100_v41 }
 0x26a   : > { %v1180_v14 = vmax.f32 %v1106_v38, 0.0 }
 0x26b   : > { %v1179_v24 = vmax.f32 %v1101_v43, 0.0 }
 0x26d   : > { %1708 = vmatprep.mubr.msk.f32.mxu0 %vm801_vm0, %v1179_v24 }
 0x26e   : > { %1709 = vmatmul.mubr.msk.f32.vlgmr.msra.gmra.mrb[16].mxu0 %vm801_vm0, %v1180_v14 }
 0x294   : > { %v1681_v45 = vpop.f32.mrb[2].mxu1 }
 0x295   : > { %v1116_v29 = vadd.f32 %v1681_v45, %v1516_v36  ;;  %v1110_v39 = vpop.f32.mrb[3].mxu1 }
 0x296   : > { %v1111_v40 = vadd.f32 %v1516_v36, %v1110_v39 }
 0x297   : > { %v1182_v25 = vmax.f32 %v1116_v29, 0.0 }
 0x298   : > { %v1181_v42 = vmax.f32 %v1111_v40, 0.0  ;;  %v1684_v44 = vpop.f32.mrb[4].mxu1 }
 0x299   : > { %v1126_v46 = vadd.f32 %v1684_v44, %v1516_v36  ;;  %v1120_v47 = vpop.f32.mrb[5].mxu1 }
 0x29a   : > { %v1121_v48 = vadd.f32 %v1516_v36, %v1120_v47  ;;  %1711 = vmatprep.mubr.msk.f32.mxu0 %vm801_vm0, %v1181_v42 }
 0x29b   : > { %1712 = vmatmul.mubr.msk.f32.gmra.mrb[18].mxu0 %vm801_vm0, %v1182_v25  ;;  %v1184_v50 = vmax.f32 %v1126_v46, 0.0 }
 0x29c   : > { %v1183_v49 = vmax.f32 %v1121_v48, 0.0 }
 0x29e   : > { %1714 = vmatprep.mubr.msk.f32.mxu0 %vm801_vm0, %v1183_v49 }
 0x29f   : > { %1715 = vmatmul.mubr.msk.f32.gmra.mrb[20].mxu0 %vm801_vm0, %v1184_v50 }
 0x2ab   : > { %v1687_v51 = vpop.f32.mrb[6].mxu1 }
 0x2ac   : > { %v1136_v52 = vadd.f32 %v1687_v51, %v1516_v36  ;;  %v1130_v53 = vpop.f32.mrb[7].mxu1 }
 0x2ad   : > { %v1131_v16 = vadd.f32 %v1516_v36, %v1130_v53 }
 0x2ae   : > { %v1186_v32 = vmax.f32 %v1136_v52, 0.0 }
 0x2af   : > { %v1185_v54 = vmax.f32 %v1131_v16, 0.0 }
 0x2b1   : > { %1717 = vmatprep.mubr.msk.f32.mxu0 %vm801_vm0, %v1185_v54 }
 0x2b2   : > { %1718 = vmatmul.mubr.msk.f32.gmra.mrb[22].mxu0 %vm801_vm0, %v1186_v32 }
 0x2cb   : > { %v1690_v55 = vpop.f32.mrb[8].mxu1 }
 0x2cc   : > { %v1146_v56 = vadd.f32 %v1690_v55, %v1516_v36  ;;  %v1140_v57 = vpop.f32.mrb[9].mxu1 }
 0x2cd   : > { %v1141_v58 = vadd.f32 %v1516_v36, %v1140_v57 }
 0x2ce   : > { %v1188_v26 = vmax.f32 %v1146_v56, 0.0 }
 0x2cf   : > { %v1187_v59 = vmax.f32 %v1141_v58, 0.0 }
 0x2d1   : > { %1720 = vmatprep.mubr.msk.f32.mxu0 %vm801_vm0, %v1187_v59 }
 0x2d2   : > { %1721 = vmatmul.mubr.msk.f32.gmra.mrb[24].mxu0 %vm801_vm0, %v1188_v26 }
 0x2e3   : > { %v1693_v60 = vpop.f32.mrb[10].mxu1 }
 0x2e4   : > { %v1156_v61 = vadd.f32 %v1693_v60, %v1516_v36  ;;  %v1150_v21 = vpop.f32.mrb[11].mxu1 }
 0x2e5   : > { %v1151_v31 = vadd.f32 %v1516_v36, %v1150_v21 }
 0x2e6   : > { %v1190_v63 = vmax.f32 %v1156_v61, 0.0 }
 0x2e7   : > { %v1189_v62 = vmax.f32 %v1151_v31, 0.0 }
 0x2e9   : > { %1723 = vmatprep.mubr.msk.f32.mxu0 %vm801_vm0, %v1189_v62 }
 0x2ea   : > { %1724 = vmatmul.mubr.msk.f32.gmra.mrb[26].mxu0 %vm801_vm0, %v1190_v63 }
 0x2f7   : > { %v1696_v2 = vpop.f32.mrb[12].mxu1 }
 0x2f8   : > { %v1166_v3 = vadd.f32 %v1696_v2, %v1516_v36  ;;  %v1160_v4 = vpop.f32.mrb[13].mxu1 }
 0x2f9   : > { %v1161_v5 = vadd.f32 %v1516_v36, %v1160_v4 }
 0x2fa   : > { %v1192_v9 = vmax.f32 %v1166_v3, 0.0 }
 0x2fb   : > { %v1191_v7 = vmax.f32 %v1161_v5, 0.0 }
 0x2fd   : > { %1726 = vmatprep.mubr.msk.f32.mxu0 %vm801_vm0, %v1191_v7 }
 0x2fe   : > { %1727 = vmatmul.mubr.msk.f32.gmra.mrb[28].mxu0 %vm801_vm0, %v1192_v9 }
 0x309   : > { %v1699_v10 = vpop.f32.mrb[14].mxu1 }
 0x30a   : > { %v1176_v11 = vadd.f32 %v1699_v10, %v1516_v36  ;;  %v1170_v12 = vpop.f32.mrb[15].mxu1 }
 0x30b   : > { %v1171_v13 = vadd.f32 %v1516_v36, %v1170_v12 }
 0x30c   : > { %v1194_v17 = vmax.f32 %v1176_v11, 0.0 }
 0x30d   : > { %v1193_v15 = vmax.f32 %v1171_v13, 0.0 }
 0x30f   : > { %1729 = vmatprep.mubr.msk.f32.mxu1 %vm801_vm0, %v1193_v15 }
 0x310   : > { %1730 = vmatmul.mubr.msk.f32.vlgmr.msra.gmra.mrb[16].mxu1 %vm801_vm0, %v1194_v17 }
 0x341   : > { %v1710_v19 = vpop.f32.mrb[16].mxu0 }
 0x342   : > { %v1326_v35 = vadd.f32 %v1710_v19, %v1517_v18  ;;  %v1320_v22 = vpop.f32.mrb[17].mxu0 }
 0x343   : > { %v1321_v20 = vadd.f32 %v1517_v18, %v1320_v22 }
 0x344   : > { %1400 = vst [vmem:[%s2389_s25 + $0x8] sm:$0xff] %v1326_v35 }
 0x345   : > { %1399 = vst [vmem:[%s2389_s25] sm:$0xff] %v1321_v20 }
 0x36e   : > { %v1713_v1 = vpop.f32.mrb[18].mxu0 }
 0x36f   : > { %v1336_v6 = vadd.f32 %v1713_v1, %v1517_v18  ;;  %v1330_v23 = vpop.f32.mrb[19].mxu0 }
 0x370   : > { %v1331_v27 = vadd.f32 %v1517_v18, %v1330_v23 }
 0x371   : > { %1402 = vst [vmem:[%s2389_s25 + $0x18] sm:$0xff] %v1336_v6 }
 0x372   : > { %1401 = vst [vmem:[%s2389_s25 + $0x10] sm:$0xff] %v1331_v27  ;;  %v1716_v28 = vpop.f32.mrb[20].mxu0 }
 0x373   : > { %v1346_v30 = vadd.f32 %v1716_v28, %v1517_v18  ;;  %v1340_v8 = vpop.f32.mrb[21].mxu0 }
 0x374   : > { %v1341_v0 = vadd.f32 %v1517_v18, %v1340_v8 }
 0x375   : > { %1404 = vst [vmem:[%s2389_s25 + $0x28] sm:$0xff] %v1346_v30 }
 0x376   : > { %1403 = vst [vmem:[%s2389_s25 + $0x20] sm:$0xff] %v1341_v0 }
 0x385   : > { %v1719_v33 = vpop.f32.mrb[22].mxu0 }
 0x386   : > { %v1356_v34 = vadd.f32 %v1719_v33, %v1517_v18  ;;  %v1350_v36 = vpop.f32.mrb[23].mxu0 }
 0x387   : > { %v1351_v37 = vadd.f32 %v1517_v18, %v1350_v36 }
 0x388   : > { %1406 = vst [vmem:[%s2389_s25 + $0x38] sm:$0xff] %v1356_v34 }
 0x389   : > { %1405 = vst [vmem:[%s2389_s25 + $0x30] sm:$0xff] %v1351_v37 }
 0x3a5   : > { %v1722_v38 = vpop.f32.mrb[24].mxu0 }
 0x3a6   : > { %v1366_v41 = vadd.f32 %v1722_v38, %v1517_v18  ;;  %v1360_v43 = vpop.f32.mrb[25].mxu0 }
 0x3a7   : > { %v1361_v24 = vadd.f32 %v1517_v18, %v1360_v43 }
 0x3a8   : > { %1408 = vst [vmem:[%s2389_s25 + $0x48] sm:$0xff] %v1366_v41 }
 0x3a9   : > { %1407 = vst [vmem:[%s2389_s25 + $0x40] sm:$0xff] %v1361_v24 }
 0x3bd   : > { %v1725_v14 = vpop.f32.mrb[26].mxu0 }
 0x3be   : > { %v1376_v45 = vadd.f32 %v1725_v14, %v1517_v18  ;;  %v1370_v29 = vpop.f32.mrb[27].mxu0 }
 0x3bf   : > { %v1371_v39 = vadd.f32 %v1517_v18, %v1370_v29 }
 0x3c0   : > { %1410 = vst [vmem:[%s2389_s25 + $0x58] sm:$0xff] %v1376_v45 }
 0x3c1   : > { %1409 = vst [vmem:[%s2389_s25 + $0x50] sm:$0xff] %v1371_v39 }
 0x3d1   : > { %v1728_v40 = vpop.f32.mrb[28].mxu0 }
 0x3d2   : > { %v1386_v42 = vadd.f32 %v1728_v40, %v1517_v18  ;;  %v1380_v44 = vpop.f32.mrb[29].mxu0 }
 0x3d3   : > { %v1381_v25 = vadd.f32 %v1517_v18, %v1380_v44 }
 0x3d4   : > { %1412 = vst [vmem:[%s2389_s25 + $0x68] sm:$0xff] %v1386_v42 }
 0x3d5   : > { %1411 = vst [vmem:[%s2389_s25 + $0x60] sm:$0xff] %v1381_v25 }
 0x3e3   : > { %v1731_v46 = vpop.f32.mrb[16].mxu1 }
 0x3e4   : > { %v1396_v47 = vadd.f32 %v1731_v46, %v1517_v18  ;;  %v1390_v48 = vpop.f32.mrb[17].mxu1 }
 0x3e5   : > { %v1391_v49 = vadd.f32 %v1517_v18, %v1390_v48 }
 0x3e6   : > { %1414 = vst [vmem:[%s2389_s25 + $0x78] sm:$0xff] %v1396_v47 }
 0x3e7   : > { %1413 = vst [vmem:[%s2389_s25 + $0x70] sm:$0xff] %v1391_v49 }
 0x3e8   : > { %1877 = shalt.err (!%p1874_p3)
}
 0x3e9   : > { %s1878_s22 = scalar_lea.hbm %s2410_s16, 2048  ;;  %s1882_s27 = scalar_lea.hbm %s2468_s9, 4096 }
 0x3ea   : > { %p1879_p4 = scmp.ne.s32.totalorder %s2410_s16, %s1878_s22  ;;  %p1883_p9 = scmp.lt.u32.totalorder %s2410_s16, %s2468_s9 }
 0x3eb   : > { %p1884_p10 = scmp.lt.u32.totalorder %s1882_s27, %s1878_s22  ;;  %p1886_p12 = scmp.lt.u32.totalorder %s1878_s22, %s2410_s16 }
 0x3ec   : > { %p1880_p7 = pnand %p1879_p4, %p2023_p5 }
 0x3ed   : > { %p1885_p11 = por %p1884_p10, %p1883_p9 }
 0x3ee   : > { %p1881_p8 = pneg %p1880_p7 }
 0x3ef   : > { %p1887_p13 = por %p1886_p12, %p1885_p11 }
 0x3f1   : > { %p1888_p0 = pnand %p1887_p13, %p1881_p8 }
 0x3f3   : > { %1891 = shalt.err (!%p1888_p0)
}
 0x3f4   : > { %s1933_s13 = smov 128   ;;  %s1934_s21 = smov 8  }
 0x3f5   : > { %1784 = dma.vmem_to_hbm [thread:$0]  (%p2023_p5), %s2412_s28, 2048, %s2410_s16, %s2418_s17, %s1933_s13, %s1933_s13, %s1934_s21  }
 0x3f6 PF: > { %p1790_p1 = scmp.ge.s32.totalorder %s1926_s12, 2  ;;  %s1444_s23 = sand.u32 1, %s1914_s30  }
 0x3f7   : > { %s1445_s24 = scalar_lea.sflag [#allocation3], %s1444_s23 }
 0x3f8   : > { %p1787_p2 = pnand %p1790_p1, %p2027_p6 }
 0x3fa   : > { %1909 = dma.done.wait (!%p1787_p2), %s1445_s24, 2048  }
 0x3fb   : > { %1911 = vsyncadd (!%p1787_p2), %s1445_s24, 4294965248  ;;  %p19_p3 = scmp.ge.s32.totalorder %s2010_s15, 4   ;;  %s2471_s30 = smov %s1918_s10 }
 0x3fc   : > { %s2472_s10 = smov %s1922_s11  ;;  %s2473_s11 = smov %s2021_s18 }
 0x3fd   : > { %s2474_s12 = smov %s2010_s15  ;;  %21 = sbr.rel (!%p19_p3) target bundleno = 3 (0x3), region = 91 }
 0x404   :  { %1450 = vsyncpa [#allocation3], 1 }
 0x405   :  { %1452 = vsyncpa [#allocation3 + $0x1], 1 }

</bundles_post_ra>
